<compile_context>
chip_gen: v7x
topology: tpu7x:2x2x1
jax: 0.10.0
libtpu: 0.0.40
codegen_flags: <defaults>
</compile_context>

<pallas_src>
import jax
import jax.numpy as jnp
from jax.experimental import pallas as pl
from jax.experimental.pallas import tpu as pltpu


def _round_up(x, m):
    return ((x + m - 1) // m) * m


def _aim_focuser_kernel(learn_ref, interp_ref, w1_ref, b1_ref, w2_ref, b2_ref,
                        logits_ref, comb_ref):
    learn = learn_ref[...]      # (TILE_B, F)
    interp = interp_ref[...]    # (TILE_B, F)
    f = learn.shape[-1]

    # combined = concat([learnable, interpretable], axis=1): two lane-aligned static
    # stores into the combined block (output or scratch) -- no XLU lane shuffle.
    comb_ref[:, :f] = learn
    comb_ref[:, f:] = interp

    # Layer 1, both heads fused along N: read the concat back from VMEM and do a single
    # K=2F MXU pass (instead of two K=F partial dots).
    w1 = w1_ref[...]                              # (2F, 2*hidden), resident
    comb = comb_ref[...].astype(w1.dtype)         # VPU cast (no-op in f32 mode)
    h = jnp.dot(comb, w1, preferred_element_type=jnp.float32) + b1_ref[...]
    h = jnp.maximum(h, 0.0)                       # ReLU; Dropout = identity at inference

    # Layer 2, both heads fused into one block-diagonal weight: one matmul + one
    # lane-dense (128-padded) store. GRL is identity in the forward pass.
    w2 = w2_ref[...]                              # (2*hidden, n_out_pad), resident
    logits_ref[...] = (
        jnp.dot(h.astype(w2.dtype), w2, preferred_element_type=jnp.float32) + b2_ref[...]
    )


def aim_focuser_forward(learnable, interpretable, params, *, tile_b=None,
                        use_bf16=False, return_combined=True):
    """Pallas-backed AimFocuser forward.

    Returns (id_logits, char_logits, combined) (combined omitted if
    return_combined=False).
    """
    B, F = learnable.shape
    assert interpretable.shape == (B, F)
    assert F % 128 == 0, "feature_dim must be a multiple of 128 (pad in the caller)"
    two_f = 2 * F
    hidden = params["w1_id"].shape[1]
    n_id = params["w2_id"].shape[1]
    n_char = params["w2_char"].shape[1]
    n_out = n_id + n_char
    n_out_pad = _round_up(n_out, 128)

    w_dtype = jnp.bfloat16 if use_bf16 else jnp.float32

    # --- wrapper-side weight plumbing (numerically identity) -------------------
    # Layer 1: both heads fused along N -> (2F, 2*hidden); one resident block.
    w1 = jnp.concatenate([params["w1_id"], params["w1_char"]], axis=1).astype(w_dtype)
    b1 = jnp.concatenate([params["b1_id"], params["b1_char"]]).reshape(1, 2 * hidden)
    b1 = b1.astype(jnp.float32)

    # Layer 2: block-diagonal fusion of both heads, padded to a lane-dense width.
    w2 = jnp.zeros((2 * hidden, n_out_pad), w_dtype)
    w2 = w2.at[:hidden, :n_id].set(params["w2_id"].astype(w_dtype))
    w2 = w2.at[hidden:, n_id:n_out].set(params["w2_char"].astype(w_dtype))
    b2 = jnp.zeros((1, n_out_pad), jnp.float32)
    b2 = b2.at[0, :n_id].set(params["b2_id"])
    b2 = b2.at[0, n_id:n_out].set(params["b2_char"])

    # --- tile sizing ------------------------------------------------------------
    # Aim for >=4 grid steps (keeps both v7x TensorCores busy and lets the BlockSpec
    # pipeline overlap DMA with compute), sublane-aligned, capped at 512 rows.
    if tile_b is None:
        tile_b = max(8, min(512, _round_up(pl.cdiv(B, 4), 8)))
    tile_b = max(8, _round_up(tile_b, 8))

    # Conservative VMEM budget (v7x physical VMEM is 64 MiB): single-buffered weights
    # + double-buffered activation / output slabs; shrink tile_b until it fits.
    weight_bytes = ((w1.size + w2.size) * w1.dtype.itemsize
                    + (b1.size + b2.size) * 4)

    def _vmem_bytes(tb):
        act_bytes = 2 * (2 * tb * F + tb * two_f + tb * n_out_pad) * 4
        return act_bytes + weight_bytes

    budget = 48 << 20
    while tile_b > 8 and _vmem_bytes(tile_b) > budget:
        tile_b = max(8, _round_up(tile_b // 2, 8))

    B_pad = _round_up(B, tile_b)
    if B_pad != B:
        pad = ((0, B_pad - B), (0, 0))
        learnable_p = jnp.pad(learnable, pad)
        interpretable_p = jnp.pad(interpretable, pad)
    else:
        learnable_p, interpretable_p = learnable, interpretable

    grid = (B_pad // tile_b,)

    def act_spec(feat):
        # batch-tiled, pipelined (double-buffered by default)
        return pl.BlockSpec((tile_b, feat), lambda i: (i, 0))

    def resident(shape):
        # DMA'd once, single-buffered, stays in VMEM across all grid steps
        return pl.BlockSpec(shape, lambda i: (0, 0), pipeline_mode=pl.Buffered(1))

    out_shape = [jax.ShapeDtypeStruct((B_pad, n_out_pad), jnp.float32)]
    out_specs = [act_spec(n_out_pad)]
    scratch_shapes = []
    if return_combined:
        out_shape.append(jax.ShapeDtypeStruct((B_pad, two_f), learnable.dtype))
        out_specs.append(act_spec(two_f))
    else:
        # combined not needed by the caller: keep the concat purely in VMEM scratch.
        scratch_shapes.append(pltpu.VMEM((tile_b, two_f), learnable.dtype))

    vmem_limit = int(min(max(_vmem_bytes(tile_b) * 5 // 4 + (2 << 20), 32 << 20), 96 << 20))

    outs = pl.pallas_call(
        _aim_focuser_kernel,
        grid=grid,
        out_shape=tuple(out_shape),
        in_specs=[
            act_spec(F), act_spec(F),
            resident((two_f, 2 * hidden)), resident((1, 2 * hidden)),
            resident((2 * hidden, n_out_pad)), resident((1, n_out_pad)),
        ],
        out_specs=tuple(out_specs),
        scratch_shapes=tuple(scratch_shapes),
        compiler_params=pltpu.CompilerParams(
            dimension_semantics=("parallel",),
            vmem_limit_bytes=vmem_limit,
        ),
    )(learnable_p, interpretable_p, w1, b1, w2, b2)

    logits_pad = outs[0]
    id_logits = logits_pad[:B, :n_id]
    char_logits = logits_pad[:B, n_id:n_out]
    if return_combined:
        combined = outs[1][:B]
        return id_logits, char_logits, combined
    return id_logits, char_logits


def init_params(key, feature_dim, num_id_classes, num_char_classes, hidden=256):
    """Deterministic PyTorch-Linear-style init; weights stored as (in, out)."""
    two_f = 2 * feature_dim
    ks = jax.random.split(key, 8)

    def lin(kw, kb, fan_in, fan_out):
        bound = 1.0 / jnp.sqrt(fan_in)
        w = jax.random.uniform(kw, (fan_in, fan_out), jnp.float32, -bound, bound)
        b = jax.random.uniform(kb, (fan_out,), jnp.float32, -bound, bound)
        return w, b

    w1i, b1i = lin(ks[0], ks[1], two_f, hidden)
    w2i, b2i = lin(ks[2], ks[3], hidden, num_id_classes)
    w1c, b1c = lin(ks[4], ks[5], two_f, hidden)
    w2c, b2c = lin(ks[6], ks[7], hidden, num_char_classes)
    return {
        "w1_id": w1i, "b1_id": b1i, "w2_id": w2i, "b2_id": b2i,
        "w1_char": w1c, "b1_char": b1c, "w2_char": w2c, "b2_char": b2c,
    }


if __name__ == "__main__":
    # Small shapes consistent with the module (feature_dim scaled down, hidden=256 kept).
    B = 16
    TILE_B = 8               # 2 grid steps -> exercises pipelining / both v7x cores
    FEATURE_DIM = 128        # lane-aligned halves for the `combined` stores
    NUM_ID = 10
    NUM_CHAR = 62

    key = jax.random.PRNGKey(0)
    k_learn, k_interp, k_params = jax.random.split(key, 3)

    learnable = jax.random.normal(k_learn, (B, FEATURE_DIM), jnp.float32)
    interpretable = jax.random.normal(k_interp, (B, FEATURE_DIM), jnp.float32)
    params = init_params(k_params, FEATURE_DIM, NUM_ID, NUM_CHAR)

    # f32 path with the combined output (exact parity with the PyTorch forward).
    id_logits, char_logits, combined = jax.block_until_ready(
        aim_focuser_forward(learnable, interpretable, params, tile_b=TILE_B)
    )

    # Pure-JAX reference (Dropout / GRL are identity in forward).
    comb_ref = jnp.concatenate([learnable, interpretable], axis=1)
    h_id = jnp.maximum(comb_ref @ params["w1_id"] + params["b1_id"], 0.0)
    id_ref = h_id @ params["w2_id"] + params["b2_id"]
    h_c = jnp.maximum(comb_ref @ params["w1_char"] + params["b1_char"], 0.0)
    char_ref = h_c @ params["w2_char"] + params["b2_char"]

    assert id_logits.shape == (B, NUM_ID)
    assert char_logits.shape == (B, NUM_CHAR)
    assert combined.shape == (B, 2 * FEATURE_DIM)
    assert jnp.allclose(id_logits, id_ref, atol=1e-4)
    assert jnp.allclose(char_logits, char_ref, atol=1e-4)
    assert jnp.allclose(combined, comb_ref, atol=1e-6)

    # heads-only path (combined kept in VMEM scratch, no pure-copy HBM writeback).
    id2, char2 = jax.block_until_ready(
        aim_focuser_forward(learnable, interpretable, params, tile_b=TILE_B,
                            return_combined=False)
    )
    assert jnp.allclose(id2, id_ref, atol=1e-4)
    assert jnp.allclose(char2, char_ref, atol=1e-4)

    # bf16-on-MXU path (f32 accumulation): smoke check only (expected ~1e-2 drift).
    id_bf, char_bf, comb_bf = jax.block_until_ready(
        aim_focuser_forward(learnable, interpretable, params, tile_b=TILE_B,
                            use_bf16=True)
    )
    assert id_bf.shape == (B, NUM_ID) and bool(jnp.all(jnp.isfinite(id_bf)))
    assert char_bf.shape == (B, NUM_CHAR) and bool(jnp.all(jnp.isfinite(char_bf)))
    assert jnp.allclose(comb_bf, comb_ref, atol=1e-6)  # combined is never quantized

    print("KERNEL_OK")

    # TODO(synk): information_bottleneck_loss (cdist/median-based) is not part of
    # forward() and is left unimplemented.
</pallas_src>

<mosaic_0001>
module attributes {stable_mosaic.version = 11 : i64} {
  func.func @_aim_focuser_kernel(%arg0: i32, %arg1: memref<8x128xf32, #tpu.memory_space<vmem>>, %arg2: memref<8x128xf32, #tpu.memory_space<vmem>>, %arg3: memref<256x512xf32, #tpu.memory_space<vmem>>, %arg4: memref<1x512xf32, #tpu.memory_space<vmem>>, %arg5: memref<512x128xf32, #tpu.memory_space<vmem>>, %arg6: memref<1x128xf32, #tpu.memory_space<vmem>>, %arg7: memref<8x128xf32, #tpu.memory_space<vmem>>, %arg8: memref<8x256xf32, #tpu.memory_space<vmem>>) attributes {dimension_semantics = [#tpu.dimension_semantics<parallel>], iteration_bounds = array<i64: 2>, scalar_prefetch = 0 : i64, scratch_operands = 0 : i64, tpu.core_type = #tpu.core_type<tc>, window_params = [{transform_indices = @transform_0, window_bounds = array<i64: 8, 128>}, {transform_indices = @transform_1, window_bounds = array<i64: 8, 128>}, {pipeline_mode = #tpu.pipeline_mode<synchronous>, transform_indices = @transform_2, window_bounds = array<i64: 256, 512>}, {pipeline_mode = #tpu.pipeline_mode<synchronous>, transform_indices = @transform_3, window_bounds = array<i64: 1, 512>}, {pipeline_mode = #tpu.pipeline_mode<synchronous>, transform_indices = @transform_4, window_bounds = array<i64: 512, 128>}, {pipeline_mode = #tpu.pipeline_mode<synchronous>, transform_indices = @transform_5, window_bounds = array<i64: 1, 128>}, {transform_indices = @transform_6, window_bounds = array<i64: 8, 128>}, {transform_indices = @transform_7, window_bounds = array<i64: 8, 256>}]} {
    %c0 = arith.constant 0 : index
    %c0_0 = arith.constant 0 : index
    %0 = vector.load %arg1[%c0, %c0_0] : memref<8x128xf32, #tpu.memory_space<vmem>>, vector<8x128xf32>
    %c0_1 = arith.constant 0 : index
    %c0_2 = arith.constant 0 : index
    %1 = vector.load %arg2[%c0_1, %c0_2] : memref<8x128xf32, #tpu.memory_space<vmem>>, vector<8x128xf32>
    %c0_3 = arith.constant 0 : index
    %c0_4 = arith.constant 0 : index
    %2 = vector.load %arg8[%c0_3, %c0_4] : memref<8x256xf32, #tpu.memory_space<vmem>>, vector<8x128xf32>
    tpu.vector_store %arg8[%c0_3, %c0_4], %0 {strides = array<i32>} : memref<8x256xf32, #tpu.memory_space<vmem>>, vector<8x128xf32>,
    %c0_5 = arith.constant 0 : index
    %c128 = arith.constant 128 : index
    %3 = vector.load %arg8[%c0_5, %c128] : memref<8x256xf32, #tpu.memory_space<vmem>>, vector<8x128xf32>
    tpu.vector_store %arg8[%c0_5, %c128], %1 {strides = array<i32>} : memref<8x256xf32, #tpu.memory_space<vmem>>, vector<8x128xf32>,
    %c0_6 = arith.constant 0 : index
    %c0_7 = arith.constant 0 : index
    %4 = vector.load %arg3[%c0_6, %c0_7] : memref<256x512xf32, #tpu.memory_space<vmem>>, vector<256x512xf32>
    %c0_8 = arith.constant 0 : index
    %c0_9 = arith.constant 0 : index
    %5 = vector.load %arg8[%c0_8, %c0_9] : memref<8x256xf32, #tpu.memory_space<vmem>>, vector<8x256xf32>
    %cst = arith.constant dense<0.000000e+00> : vector<8x512xf32>
    %6 = tpu.matmul %5, %4, %cst {dimension_numbers = #tpu.dot_dimension_numbers<[1], [0], [0], [1], [0, 0, 1, 1], [], []>} : vector<8x256xf32>, vector<256x512xf32>, vector<8x512xf32> -> vector<8x512xf32>
    %c0_10 = arith.constant 0 : index
    %c0_11 = arith.constant 0 : index
    %7 = vector.load %arg4[%c0_10, %c0_11] : memref<1x512xf32, #tpu.memory_space<vmem>>, vector<1x512xf32>
    %8 = vector.broadcast %7 : vector<1x512xf32> to vector<8x512xf32>
    %9 = arith.addf %6, %8 : vector<8x512xf32>
    %cst_12 = arith.constant 0.000000e+00 : f32
    %10 = vector.broadcast %cst_12 : f32 to vector<8x512xf32>
    %11 = arith.maximumf %9, %10 : vector<8x512xf32>
    %c0_13 = arith.constant 0 : index
    %c0_14 = arith.constant 0 : index
    %12 = vector.load %arg5[%c0_13, %c0_14] : memref<512x128xf32, #tpu.memory_space<vmem>>, vector<512x128xf32>
    %cst_15 = arith.constant dense<0.000000e+00> : vector<8x128xf32>
    %13 = tpu.matmul %11, %12, %cst_15 {dimension_numbers = #tpu.dot_dimension_numbers<[1], [0], [0], [1], [0, 0, 1, 1], [], []>} : vector<8x512xf32>, vector<512x128xf32>, vector<8x128xf32> -> vector<8x128xf32>
    %c0_16 = arith.constant 0 : index
    %c0_17 = arith.constant 0 : index
    %14 = vector.load %arg6[%c0_16, %c0_17] : memref<1x128xf32, #tpu.memory_space<vmem>>, vector<1x128xf32>
    %15 = vector.broadcast %14 : vector<1x128xf32> to vector<8x128xf32>
    %16 = arith.addf %13, %15 : vector<8x128xf32>
    %c0_18 = arith.constant 0 : index
    %c0_19 = arith.constant 0 : index
    %17 = vector.load %arg7[%c0_18, %c0_19] : memref<8x128xf32, #tpu.memory_space<vmem>>, vector<8x128xf32>
    tpu.vector_store %arg7[%c0_18, %c0_19], %16 {strides = array<i32>} : memref<8x128xf32, #tpu.memory_space<vmem>>, vector<8x128xf32>,
    return
  }
  func.func @transform_0(%arg0: i32) -> (i32, i32) {
    %c0_i32 = arith.constant 0 : i32
    %c0_i32_0 = arith.constant 0 : i32
    return %arg0, %c0_i32 : i32, i32
  }
  func.func @transform_1(%arg0: i32) -> (i32, i32) {
    %c0_i32 = arith.constant 0 : i32
    %c0_i32_0 = arith.constant 0 : i32
    return %arg0, %c0_i32 : i32, i32
  }
  func.func @transform_2(%arg0: i32) -> (i32, i32) {
    %c0_i32 = arith.constant 0 : i32
    %c0_i32_0 = arith.constant 0 : i32
    %c0_i32_1 = arith.constant 0 : i32
    return %c0_i32, %c0_i32_0 : i32, i32
  }
  func.func @transform_3(%arg0: i32) -> (i32, i32) {
    %c0_i32 = arith.constant 0 : i32
    %c0_i32_0 = arith.constant 0 : i32
    %c0_i32_1 = arith.constant 0 : i32
    return %c0_i32, %c0_i32_0 : i32, i32
  }
  func.func @transform_4(%arg0: i32) -> (i32, i32) {
    %c0_i32 = arith.constant 0 : i32
    %c0_i32_0 = arith.constant 0 : i32
    %c0_i32_1 = arith.constant 0 : i32
    return %c0_i32, %c0_i32_0 : i32, i32
  }
  func.func @transform_5(%arg0: i32) -> (i32, i32) {
    %c0_i32 = arith.constant 0 : i32
    %c0_i32_0 = arith.constant 0 : i32
    %c0_i32_1 = arith.constant 0 : i32
    return %c0_i32, %c0_i32_0 : i32, i32
  }
  func.func @transform_6(%arg0: i32) -> (i32, i32) {
    %c0_i32 = arith.constant 0 : i32
    %c0_i32_0 = arith.constant 0 : i32
    return %arg0, %c0_i32 : i32, i32
  }
  func.func @transform_7(%arg0: i32) -> (i32, i32) {
    %c0_i32 = arith.constant 0 : i32
    %c0_i32_0 = arith.constant 0 : i32
    return %arg0, %c0_i32 : i32, i32
  }
}

</mosaic_0001>

<bundles_post_ra>
// kernel: tpu_custom_call.1
= control target key start
LH: loop header
LB: loop body
LE: loop exit
PB: predicated region body
PF: predicated region fallthrough
CT: control target
= control target key end

     0   :  { %s2027_s0 = inlined_call_operand.hbm [shape: f32[16,128], index: 0, kind: input, shape index: {}]   ;;  %s2028_s1 = inlined_call_operand.hbm [shape: f32[16,128], index: 1, kind: input, shape index: {}]   ;;  %s2029_s2 = inlined_call_operand.hbm [shape: f32[256,512], index: 2, kind: input, shape index: {}]   ;;  %s2030_s3 = inlined_call_operand.vmem [shape: f32[1,512], index: 3, kind: input, shape index: {}]   ;;  %s2031_s4 = inlined_call_operand.hbm [shape: f32[512,128], index: 4, kind: input, shape index: {}]   ;;  %s2032_s5 = inlined_call_operand.vmem [shape: f32[1,128], index: 5, kind: input, shape index: {}]   ;;  %s2033_s6 = inlined_call_operand.hbm [shape: f32[16,128], index: 6, kind: output, shape index: {0}]   ;;  %s2034_s7 = inlined_call_operand.hbm [shape: f32[16,256], index: 7, kind: output, shape index: {1}]  }
   0x1   :  { %2040 = sst [smem:[#allocation21_spill]] %s2029_s2 }
   0x2   :  { %2041 = sst [smem:[#allocation22_spill]] %s2031_s4 }
   0x3   :  { %13 = vsyncpa [#allocation3], 0 }
   0x4   :  { %15 = vsyncpa [#allocation3 + $0x1], 0 }
   0x5   :  { %16 = vsyncpa [#allocation6], 0 }
   0x6   :  { %18 = vsyncpa [#allocation6 + $0x1], 0 }
   0x7   :  { %19 = vsyncpa [#allocation9], 0 }
   0x8   :  { %20 = vsyncpa [#allocation4], 0 }
   0x9   :  { %22 = vsyncpa [#allocation4 + $0x1], 0 }
   0xa   :  { %23 = vsyncpa [#allocation12], 0 }
   0xb   :  { %25 = vsyncpa [#allocation12 + $0x1], 0  ;;  %s1708_s24 = smov 0   ;;  %s1710_s25 = smov 0  }
   0xc   :  { %s1712_s26 = smov 0   ;;  %s1714_s27 = smov 0  }
   0xd LB: > { %2042 = sst [smem:[#allocation19_spill]] %s1652_s26  ;;  %s1729_s28 = sadd.s32 4294967295, %s1656_s27   ;;  %s1656_s27 = sphi %s1714_s27, %s2066_s27   ;;  %s1652_s26 = sphi %s1712_s26, %s2063_s26   ;;  %s1648_s25 = sphi %s1710_s25, %s2065_s25   ;;  %s1644_s24 = sphi %s1708_s24, %s2064_s24  }
   0xe   : > { %s1062_s29 = sadd.s32 4294967294, %s1656_s27   ;;  %p51_p0 = scmp.ne.s32.totalorder %s1648_s25, %s1644_s24 }
   0xf   : > { %p2035_p1 = scmp.eq.s32.totalorder %s1729_s28, 0  ;;  %p191_p3 = scmp.eq.s32.totalorder %s1062_s29, 1 }
  0x10   : > { %p1063_p5 = scmp.ge.s32.totalorder %s1656_s27, 1  ;;  %p224_p7 = scmp.lt.s32.totalorder %s1656_s27, 3 }
  0x11   : > { %p1738_p4 = por %p2035_p1, %p51_p0  ;;  %p1743_p6 = por %p191_p3, %p51_p0 }
  0x12   : > { %p1748_p8 = pnand %p1063_p5, %p224_p7  ;;  %s1658_s10 = smov [#allocation7]  }
  0x13   : > { %s2043_s30 = scalar_select %p1738_p4, 1, 0 }
  0x14   : > { %s2044_s8 = scalar_select %p1743_p6, 1, 0 }
  0x15   : > { %s2045_s9 = scalar_select %p1748_p8, 1, 0 }
  0x16   : > { %s236_s11 = sshll.u32 %s1658_s10, 4  ;;  %p1365_p9 = pneg %p1748_p8  ;;  %s1752_s11 = int_to_ptr.vmem [resolvable:$true] %s236_s11 }
  0x17   : > { %s1659_s13 = smov [#allocation8]   ;;  %s2047_s2 = sld [smem:[#allocation21_spill]] }
  0x18   : > { %p1759_p11 = pnand %p1365_p9, %p2035_p1  ;;  %s252_s14 = sshll.u32 %s1659_s13, 4  ;;  %s1763_s14 = int_to_ptr.vmem [resolvable:$true] %s252_s14 }
  0x1a   : > { %p1432_p13 = pneg %p1759_p11 }
  0x1d   : > { %s1430_s17 = scalar_lea.hbm %s2047_s2, 16384 }
  0x1e   : > { %p1431_p12 = scmp.ne.s32.totalorder %s2047_s2, %s1430_s17  ;;  %p1437_p5 = scmp.lt.u32.totalorder %s1430_s17, %s2047_s2 }
  0x20   : > { %p1433_p0 = pnand %p1432_p13, %p1431_p12 }
  0x22   : > { %p1434_p3 = pneg %p1433_p0 }
  0x24   : > { %p1439_p7 = pnand %p1437_p5, %p1434_p3 }
  0x26   : > { %1442 = shalt.err (!%p1439_p7)
}
  0x27   : > { %s1443_s22 = scalar_lea.vmem %s1752_s11, 16384  ;;  %p1451_p2 = scmp.lt.s32.totalorder %s1752_s11, %s1752_s11 }
  0x28   : > { %p1444_p9 = scmp.ne.s32.totalorder %s1752_s11, %s1443_s22  ;;  %p1452_p12 = scmp.lt.s32.totalorder %s1443_s22, %s1443_s22 }
  0x2a   : > { %p1446_p10 = pnand %p1444_p9, %p1432_p13  ;;  %p1453_p0 = por %p1452_p12, %p1451_p2 }
  0x2c   : > { %p1447_p1 = pneg %p1446_p10 }
  0x2e   : > { %p1454_p6 = pnand %p1453_p0, %p1447_p1 }
  0x30   : > { %1457 = shalt.err (!%p1454_p6)
}
  0x31   : > { %s1660_s23 = smov 512   ;;  %s1661_s29 = smov 32  }
  0x32   : > { %1368 = dma.hbm_to_vmem [thread:$0]  (!%p1759_p11), %s2047_s2, 16384, %s1752_s11, [#allocation6], %s1660_s23, %s1660_s23, %s1661_s29  }
  0x33   : > { %s2048_s4 = sld [smem:[#allocation22_spill]] }
  0x39   : > { %s1458_s17 = scalar_lea.hbm %s2048_s4, 8192 }
  0x3a   : > { %p1459_p2 = scmp.ne.s32.totalorder %s2048_s4, %s1458_s17  ;;  %p1465_p10 = scmp.lt.u32.totalorder %s1458_s17, %s2048_s4 }
  0x3c   : > { %p1461_p1 = pnand %p1459_p2, %p1432_p13 }
  0x3e   : > { %p1462_p6 = pneg %p1461_p1 }
  0x40   : > { %p1467_p3 = pnand %p1465_p10, %p1462_p6 }
  0x42   : > { %1470 = shalt.err (!%p1467_p3)
}
  0x43   : > { %s1471_s11 = scalar_lea.vmem %s1763_s14, 8192  ;;  %p1479_p12 = scmp.lt.s32.totalorder %s1763_s14, %s1763_s14 }
  0x44   : > { %p1472_p5 = scmp.ne.s32.totalorder %s1763_s14, %s1471_s11  ;;  %p1480_p0 = scmp.lt.s32.totalorder %s1471_s11, %s1471_s11 }
  0x46   : > { %p1474_p7 = pnand %p1472_p5, %p1432_p13  ;;  %p1481_p2 = por %p1480_p0, %p1479_p12 }
  0x48   : > { %p1475_p9 = pneg %p1474_p7 }
  0x4a   : > { %p1482_p1 = pnand %p1481_p2, %p1475_p9 }
  0x4c   : > { %1485 = shalt.err (!%p1482_p1)
}
  0x4d   : > { %s1662_s22 = smov 128   ;;  %s1663_s23 = smov 8  }
  0x4e   : > { %1371 = dma.hbm_to_vmem [thread:$0]  (!%p1759_p11), %s2048_s4, 8192, %s1763_s14, [#allocation9], %s1662_s22, %s1662_s22, %s1663_s23  }
  0x4f   : > { %s1818_s13 = sadd.s32 1, %s1656_s27   ;;  %s38_s16 = sadd.s32 1, %s1652_s26 }
  0x50   : > { %s35_s15 = ssub.s32 %s1656_s27, %s1818_s13  ;;  %p45_p6 = scmp.ne.s32.totalorder %s1652_s26, %s1648_s25 }
  0x51   : > { %p36_p13 = scmp.eq.s32.totalorder %s35_s15, 0  ;;  %p46_p10 = scmp.eq.s32.totalorder %s1656_s27, 0 }
  0x52   : > { %p2050_p5 = scmp.eq.s32.totalorder %s1729_s28, 1  ;;  %p1388_p9 = scmp.lt.s32.totalorder %s1656_s27, 2 }
  0x53   : > { %s1827_s17 = scalar_select %p36_p13, %s1652_s26, %s38_s16  }
  0x54   : > { %p47_p3 = por %p46_p10, %p45_p6  ;;  %p1831_p7 = por %p2050_p5, %p45_p6 }
  0x55   : > { %2049 = sst [smem:[#allocation20_spill]] %s1827_s17  ;;  %s269_s12 = sand.u32 1, %s1652_s26  }
  0x56   : > { %s2051_s18 = scalar_select %p1831_p7, 1, 0 }
  0x57   : > { %s1837_s14 = sshll.u32 %s269_s12, 3  ;;  %s1068_s19 = sshll.u32 %s1656_s27, 7 }
  0x58   : > { %s1843_s11 = scalar_lea.hbm %s2027_s0, %s1068_s19  ;;  %s273_s22 = scalar_lea.vmem [#allocation2], %s1837_s14 }
  0x59   : > { %s280_s23 = sshll.u32 %s273_s22, 4  ;;  %p1848_p11 = pnand %p1388_p9, %p47_p3  ;;  %s1846_s23 = int_to_ptr.vmem [resolvable:$true] %s280_s23 }
  0x5a   : > { %s1855_s16 = scalar_lea.hbm %s2028_s1, %s1068_s19  ;;  %s287_s20 = sand.u32 1, %s1656_s27  }
  0x5b   : > { %s270_s21 = scalar_lea.sflag [#allocation3], %s269_s12  ;;  %s1486_s2 = scalar_lea.hbm %s1843_s11, 128 }
  0x5c   : > { %p1487_p12 = scmp.ne.s32.totalorder %s1843_s11, %s1486_s2  ;;  %p1488_p0 = pneg %p1848_p11 }
  0x5d   : > { %s1491_s17 = scalar_lea.hbm %s2027_s0, 256  ;;  %p1492_p13 = scmp.lt.u32.totalorder %s1843_s11, %s2027_s0 }
  0x5e   : > { %p1489_p2 = pnand %p1488_p0, %p1487_p12  ;;  %p1493_p6 = scmp.lt.u32.totalorder %s1491_s17, %s1486_s2 }
  0x5f   : > { %p1495_p3 = scmp.lt.u32.totalorder %s1486_s2, %s1843_s11 }
  0x60   : > { %p1490_p1 = pneg %p1489_p2  ;;  %p1494_p10 = por %p1493_p6, %p1492_p13 }
  0x62   : > { %p1496_p5 = por %p1495_p3, %p1494_p10 }
  0x64   : > { %p1497_p9 = pnand %p1496_p5, %p1490_p1 }
  0x66   : > { %1500 = shalt.err (!%p1497_p9)
}
  0x67   : > { %s1501_s12 = scalar_lea.vmem %s1846_s23, 128  ;;  %s1664_s4 = smov [#allocation2]  }
  0x68   : > { %p1502_p12 = scmp.ne.s32.totalorder %s1846_s23, %s1501_s12  ;;  %s1506_s19 = sshll.u32 %s1664_s4, 4  ;;  %s1507_s19 = int_to_ptr.vmem [resolvable:$false] %s1506_s19 }
  0x69   : > { %s1508_s26 = scalar_lea.vmem %s1507_s19, 256  ;;  %p1509_p4 = scmp.lt.s32.totalorder %s1846_s23, %s1507_s19 }
  0x6a   : > { %p1504_p2 = pnand %p1502_p12, %p1488_p0  ;;  %p1510_p13 = scmp.lt.s32.totalorder %s1508_s26, %s1501_s12 }
  0x6c   : > { %p1505_p7 = pneg %p1504_p2  ;;  %p1511_p6 = por %p1510_p13, %p1509_p4 }
  0x6e   : > { %p1512_p10 = pnand %p1511_p6, %p1505_p7 }
  0x70   : > { %1515 = shalt.err (!%p1512_p10)
}
  0x71   : > { %1375 = dma.hbm_to_vmem [thread:$0]  (!%p1848_p11), %s1843_s11, 128, %s1846_s23, %s270_s21  }
  0x72   : > { %s291_s2 = scalar_lea.vmem [#allocation5], %s1837_s14  ;;  %s288_s15 = scalar_lea.sflag [#allocation6], %s287_s20 }
  0x73   : > { %s298_s17 = sshll.u32 %s291_s2, 4  ;;  %s1516_s22 = scalar_lea.hbm %s1855_s16, 128  ;;  %s299_s17 = int_to_ptr.vmem [resolvable:$true] %s298_s17 }
  0x74   : > { %p1517_p4 = scmp.ne.s32.totalorder %s1855_s16, %s1516_s22  ;;  %s1521_s4 = scalar_lea.hbm %s2028_s1, 256 }
  0x75   : > { %p1522_p3 = scmp.lt.u32.totalorder %s1855_s16, %s2028_s1  ;;  %p1523_p5 = scmp.lt.u32.totalorder %s1521_s4, %s1516_s22 }
  0x76   : > { %p1519_p7 = pnand %p1517_p4, %p1488_p0  ;;  %p1525_p12 = scmp.lt.u32.totalorder %s1516_s22, %s1855_s16 }
  0x77   : > { %p1524_p9 = por %p1523_p5, %p1522_p3 }
  0x78   : > { %p1520_p1 = pneg %p1519_p7 }
  0x79   : > { %p1526_p2 = por %p1525_p12, %p1524_p9 }
  0x7b   : > { %p1527_p13 = pnand %p1526_p2, %p1520_p1 }
  0x7d   : > { %1530 = shalt.err (!%p1527_p13)
}
  0x7e   : > { %s1531_s14 = scalar_lea.vmem %s299_s17, 128  ;;  %s1665_s11 = smov [#allocation5]  }
  0x7f   : > { %p1532_p6 = scmp.ne.s32.totalorder %s299_s17, %s1531_s14  ;;  %s1536_s23 = sshll.u32 %s1665_s11, 4  ;;  %s1537_s23 = int_to_ptr.vmem [resolvable:$false] %s1536_s23 }
  0x80   : > { %s1538_s20 = scalar_lea.vmem %s1537_s23, 256  ;;  %p1539_p7 = scmp.lt.s32.totalorder %s299_s17, %s1537_s23 }
  0x81   : > { %p1534_p10 = pnand %p1532_p6, %p1488_p0  ;;  %p1540_p8 = scmp.lt.s32.totalorder %s1538_s20, %s1531_s14 }
  0x83   : > { %p1535_p4 = pneg %p1534_p10  ;;  %p1541_p3 = por %p1540_p8, %p1539_p7 }
  0x85   : > { %p1542_p5 = pnand %p1541_p3, %p1535_p4 }
  0x87   : > { %1545 = shalt.err (!%p1542_p5)
}
  0x88   : > { %1378 = dma.hbm_to_vmem [thread:$0]  (!%p1848_p11), %s1855_s16, 128, %s299_s17, %s288_s15  }
  0x89   : > { %p2053_p1 = scmp.ne.s32.totalorder %s2045_s9, 0 }
  0x8a   : > { %s1908_s21 = sand.u32 (!%p2053_p1), 1, %s1648_s25   ;;  %p2054_p8 = scmp.ne.s32.totalorder (!%p2053_p1), %s2043_s30, 0 }
  0x8b   : > { %307 = sbr.rel (%p2053_p1) target bundleno = 676 (0x2a4), region = 44  ;;  %s1911_s2 = sshll.u32 (!%p2053_p1), %s1908_s21, 3 }
  0x8c   : > { %s310_s22 = scalar_lea.sflag (!%p2053_p1), [#allocation3], %s1908_s21  ;;  %s313_s10 = scalar_lea.vmem (!%p2053_p1), [#allocation2], %s1911_s2 }
  0x92   : > { %1619 = dma.done.wait (%p2054_p8), %s310_s22, 128  }
  0x93   : > { %1621 = vsyncadd (%p2054_p8), %s310_s22, 4294967168  ;;  %s318_s9 = sand.u32 1, %s1729_s28   ;;  %s322_s16 = scalar_lea.vmem [#allocation5], %s1911_s2 }
  0x94   : > { %s319_s29 = scalar_lea.sflag [#allocation6], %s318_s9 }
  0x95   : > { %1623 = dma.done.wait (%p2054_p8), %s319_s29, 128  }
  0x96   : > { %1625 = vsyncadd (%p2054_p8), %s319_s29, 4294967168  ;;  %p2055_p11 = scmp.eq.s32.totalorder %s1729_s28, 0 }
  0x98   : > { %1627 = dma.done.wait (%p2055_p11), [#allocation6], 16384   ;;  %p2056_p0 = pmov %p2055_p11 }
  0x9a   : > { %1629 = vsyncadd (%p2056_p0), [#allocation6], 4294950912  ;;  %p2057_p9 = pmov %p2056_p0 }
  0x9b   : > { %p2058_p12 = pmov %p2056_p0 }
  0x9c   : > { %1631 = dma.done.wait (%p2057_p9), [#allocation9], 8192  }
  0x9d   : > { %1633 = vsyncadd (%p2058_p12), [#allocation9], 4294959104  ;;  %v376_v0 = vld [vmem:[#allocation7 + $0x8] sm:$0xff]  ;;  %v378_v2 = vld [vmem:[#allocation7 + $0x18] sm:$0xff]  ;;  %s1077_s30 = sshll.u32 %s1908_s21, 4  ;;  %s1086_s4 = sshll.u32 %s1729_s28, 8 }
  0x9e   : > { %v380_v1 = vld [vmem:[#allocation7 + $0x28] sm:$0xff]  ;;  %v382_v4 = vld [vmem:[#allocation7 + $0x38] sm:$0xff]  ;;  %v375_v5 = vld [vmem:[#allocation7] sm:$0xff]  ;;  %s1940_s17 = scalar_lea.vmem [#allocation11], %s1077_s30  ;;  %s1955_s11 = scalar_lea.hbm %s2034_s7, %s1086_s4 }
  0x9f   : > { %v1157_v3 = vpack.c.bf16 %v380_v1, %v376_v0  ;;  %v379_v6 = vld [vmem:[#allocation7 + $0x20] sm:$0xff]  ;;  %v1221_v7 = vpack.c.bf16 %v382_v4, %v378_v2  ;;  %v377_v9 = vld [vmem:[#allocation7 + $0x10] sm:$0xff]  ;;  %v384_v11 = vld [vmem:[#allocation7 + $0x48] sm:$0xff]  ;;  %s918_s19 = sshll.u32 %s1940_s17, 4  ;;  %s891_s23 = scalar_lea.sflag [#allocation12], %s1908_s21  ;;  %s919_s19 = int_to_ptr.vmem [resolvable:$true] %s918_s19 }
  0xa0   : > { %v1159_v8 = vpack.c.bf16 %v379_v6, %v375_v5  ;;  %v381_v10 = vld [vmem:[#allocation7 + $0x30] sm:$0xff]  ;;  %v388_v13 = vld [vmem:[#allocation7 + $0x68] sm:$0xff]  ;;  %v386_v14 = vld [vmem:[#allocation7 + $0x58] sm:$0xff]  ;;  %s1546_s20 = scalar_lea.vmem %s919_s19, 256  ;;  %p2059_p13 = scmp.ne.s32.totalorder %s2051_s18, 0 }
  0xa1   : > { %1158 = vmatprep.subr.bf16.mxu0 %v1157_v3  ;;  %v1223_v12 = vpack.c.bf16 %v381_v10, %v377_v9  ;;  %v390_v15 = vld [vmem:[#allocation7 + $0x78] sm:$0xff]  ;;  %1222 = vmatprep.subr.bf16.mxu1 %v1221_v7  ;;  %v1161_v16 = vpack.c.bf16 %v388_v13, %v384_v11  ;;  %v383_v18 = vld [vmem:[#allocation7 + $0x40] sm:$0xff]  ;;  %v385_v20 = vld [vmem:[#allocation7 + $0x50] sm:$0xff]  ;;  %p1547_p2 = scmp.ne.s32.totalorder %s919_s19, %s1546_s20  ;;  %s1666_s22 = smov [#allocation11]  }
  0xa2   : > { %1160 = vmatpush1.bf16.msra.mxu0 %v1159_v8  ;;  %v1225_v17 = vpack.c.bf16 %v390_v15, %v386_v14  ;;  %v387_v19 = vld [vmem:[#allocation7 + $0x60] sm:$0xff]  ;;  %v389_v22 = vld [vmem:[#allocation7 + $0x70] sm:$0xff]  ;;  %v392_v23 = vld [vmem:[#allocation7 + $0x88] sm:$0xff] }
  0xa3   : > { %1224 = vmatpush1.bf16.msra.mxu1 %v1223_v12  ;;  %v1163_v21 = vpack.c.bf16 %v387_v19, %v383_v18  ;;  %v396_v24 = vld [vmem:[#allocation7 + $0xa8] sm:$0xff]  ;;  %1162 = vmatprep.subr.bf16.mxu0 %v1161_v16  ;;  %v1227_v25 = vpack.c.bf16 %v389_v22, %v385_v20  ;;  %v394_v27 = vld [vmem:[#allocation7 + $0x98] sm:$0xff]  ;;  %v391_v29 = vld [vmem:[#allocation7 + $0x80] sm:$0xff]  ;;  %p1548_p6 = pnand %p1547_p2, %p2059_p13 }
  0xa4   : > { %1226 = vmatprep.subr.bf16.mxu1 %v1225_v17  ;;  %v1165_v26 = vpack.c.bf16 %v396_v24, %v392_v23  ;;  %v398_v28 = vld [vmem:[#allocation7 + $0xb8] sm:$0xff]  ;;  %v395_v31 = vld [vmem:[#allocation7 + $0xa0] sm:$0xff]  ;;  %v393_v32 = vld [vmem:[#allocation7 + $0x90] sm:$0xff] }
  0xa5   : > { %v1229_v30 = vpack.c.bf16 %v398_v28, %v394_v27  ;;  %v397_v33 = vld [vmem:[#allocation7 + $0xb0] sm:$0xff]  ;;  %v1167_v34 = vpack.c.bf16 %v395_v31, %v391_v29  ;;  %v400_v35 = vld [vmem:[#allocation7 + $0xc8] sm:$0xff]  ;;  %v402_v37 = vld [vmem:[#allocation7 + $0xd8] sm:$0xff]  ;;  %p1549_p10 = pneg %p1548_p6 }
  0xa6   : > { %1164 = vmatpush1.bf16.msra.mxu0 %v1163_v21  ;;  %v404_v36 = vld [vmem:[#allocation7 + $0xe8] sm:$0xff]  ;;  %v1231_v38 = vpack.c.bf16 %v397_v33, %v393_v32  ;;  %v406_v40 = vld [vmem:[#allocation7 + $0xf8] sm:$0xff]  ;;  %v399_v41 = vld [vmem:[#allocation7 + $0xc0] sm:$0xff] }
  0xa7   : > { %1228 = vmatpush1.bf16.msra.mxu1 %v1227_v25  ;;  %1166 = vmatprep.subr.bf16.mxu0 %v1165_v26  ;;  %v1169_v39 = vpack.c.bf16 %v404_v36, %v400_v35  ;;  %v403_v42 = vld [vmem:[#allocation7 + $0xe0] sm:$0xff]  ;;  %v1233_v43 = vpack.c.bf16 %v406_v40, %v402_v37  ;;  %v401_v44 = vld [vmem:[#allocation7 + $0xd0] sm:$0xff]  ;;  %v408_v46 = vld [vmem:[#allocation7 + $0x108] sm:$0xff] }
  0xa8   : > { %1230 = vmatprep.subr.bf16.mxu1 %v1229_v30  ;;  %v405_v45 = vld [vmem:[#allocation7 + $0xf0] sm:$0xff]  ;;  %v412_v47 = vld [vmem:[#allocation7 + $0x128] sm:$0xff]  ;;  %v410_v48 = vld [vmem:[#allocation7 + $0x118] sm:$0xff]  ;;  %v1171_v50 = vpack.c.bf16 %v403_v42, %v399_v41 }
  0xa9   : > { %v414_v49 = vld [vmem:[#allocation7 + $0x138] sm:$0xff]  ;;  %v1235_v51 = vpack.c.bf16 %v405_v45, %v401_v44  ;;  %v1173_v52 = vpack.c.bf16 %v412_v47, %v408_v46  ;;  %v407_v53 = vld [vmem:[#allocation7 + $0x100] sm:$0xff]  ;;  %v409_v55 = vld [vmem:[#allocation7 + $0x110] sm:$0xff] }
  0xaa   : > { %1168 = vmatpush1.bf16.msra.mxu0 %v1167_v34  ;;  %v411_v54 = vld [vmem:[#allocation7 + $0x120] sm:$0xff]  ;;  %v1237_v56 = vpack.c.bf16 %v414_v49, %v410_v48  ;;  %v413_v57 = vld [vmem:[#allocation7 + $0x130] sm:$0xff]  ;;  %v416_v58 = vld [vmem:[#allocation7 + $0x148] sm:$0xff] }
  0xab   : > { %1232 = vmatpush1.bf16.msra.mxu1 %v1231_v38  ;;  %1170 = vmatprep.subr.bf16.mxu0 %v1169_v39  ;;  %v420_v59 = vld [vmem:[#allocation7 + $0x168] sm:$0xff]  ;;  %v418_v60 = vld [vmem:[#allocation7 + $0x158] sm:$0xff]  ;;  %v1175_v62 = vpack.c.bf16 %v411_v54, %v407_v53  ;;  %v1239_v63 = vpack.c.bf16 %v413_v57, %v409_v55  ;;  %v415_v1 = vld [vmem:[#allocation7 + $0x140] sm:$0xff] }
  0xac   : > { %1234 = vmatprep.subr.bf16.mxu1 %v1233_v43  ;;  %v422_v61 = vld [vmem:[#allocation7 + $0x178] sm:$0xff]  ;;  %v1177_v0 = vpack.c.bf16 %v420_v59, %v416_v58  ;;  %v419_v2 = vld [vmem:[#allocation7 + $0x160] sm:$0xff]  ;;  %v417_v3 = vld [vmem:[#allocation7 + $0x150] sm:$0xff] }
  0xad   : > { %v1241_v4 = vpack.c.bf16 %v422_v61, %v418_v60  ;;  %v421_v5 = vld [vmem:[#allocation7 + $0x170] sm:$0xff]  ;;  %v424_v6 = vld [vmem:[#allocation7 + $0x188] sm:$0xff]  ;;  %v426_v8 = vld [vmem:[#allocation7 + $0x198] sm:$0xff]  ;;  %v1179_v10 = vpack.c.bf16 %v419_v2, %v415_v1 }
  0xae   : > { %1172 = vmatpush1.bf16.msra.mxu0 %v1171_v50  ;;  %v428_v7 = vld [vmem:[#allocation7 + $0x1a8] sm:$0xff]  ;;  %v430_v9 = vld [vmem:[#allocation7 + $0x1b8] sm:$0xff]  ;;  %v1243_v11 = vpack.c.bf16 %v421_v5, %v417_v3  ;;  %v423_v13 = vld [vmem:[#allocation7 + $0x180] sm:$0xff] }
  0xaf   : > { %1236 = vmatpush1.bf16.msra.mxu1 %v1235_v51  ;;  %1174 = vmatprep.subr.bf16.mxu0 %v1173_v52  ;;  %v1181_v12 = vpack.c.bf16 %v428_v7, %v424_v6  ;;  %v427_v14 = vld [vmem:[#allocation7 + $0x1a0] sm:$0xff]  ;;  %v425_v15 = vld [vmem:[#allocation7 + $0x190] sm:$0xff]  ;;  %v1245_v16 = vpack.c.bf16 %v430_v9, %v426_v8  ;;  %v432_v18 = vld [vmem:[#allocation7 + $0x1c8] sm:$0xff] }
  0xb0   : > { %1238 = vmatprep.subr.bf16.mxu1 %v1237_v56  ;;  %v429_v17 = vld [vmem:[#allocation7 + $0x1b0] sm:$0xff]  ;;  %v436_v19 = vld [vmem:[#allocation7 + $0x1e8] sm:$0xff]  ;;  %v434_v20 = vld [vmem:[#allocation7 + $0x1d8] sm:$0xff]  ;;  %v1183_v22 = vpack.c.bf16 %v427_v14, %v423_v13 }
  0xb1   : > { %v438_v21 = vld [vmem:[#allocation7 + $0x1f8] sm:$0xff]  ;;  %v1247_v23 = vpack.c.bf16 %v429_v17, %v425_v15  ;;  %v1185_v24 = vpack.c.bf16 %v436_v19, %v432_v18  ;;  %v431_v25 = vld [vmem:[#allocation7 + $0x1c0] sm:$0xff]  ;;  %v433_v27 = vld [vmem:[#allocation7 + $0x1d0] sm:$0xff] }
  0xb2   : > { %1176 = vmatpush1.bf16.msra.mxu0 %v1175_v62  ;;  %v435_v26 = vld [vmem:[#allocation7 + $0x1e0] sm:$0xff]  ;;  %v1249_v28 = vpack.c.bf16 %v438_v21, %v434_v20  ;;  %v437_v29 = vld [vmem:[#allocation7 + $0x1f0] sm:$0xff]  ;;  %v440_v30 = vld [vmem:[#allocation7 + $0x208] sm:$0xff] }
  0xb3   : > { %1240 = vmatpush1.bf16.msra.mxu1 %v1239_v63  ;;  %1178 = vmatprep.subr.bf16.mxu0 %v1177_v0  ;;  %v444_v31 = vld [vmem:[#allocation7 + $0x228] sm:$0xff]  ;;  %v442_v32 = vld [vmem:[#allocation7 + $0x218] sm:$0xff]  ;;  %v1187_v34 = vpack.c.bf16 %v435_v26, %v431_v25  ;;  %v1251_v35 = vpack.c.bf16 %v437_v29, %v433_v27  ;;  %v439_v37 = vld [vmem:[#allocation7 + $0x200] sm:$0xff] }
  0xb4   : > { %1242 = vmatprep.subr.bf16.mxu1 %v1241_v4  ;;  %v446_v33 = vld [vmem:[#allocation7 + $0x238] sm:$0xff]  ;;  %v1189_v36 = vpack.c.bf16 %v444_v31, %v440_v30  ;;  %v443_v38 = vld [vmem:[#allocation7 + $0x220] sm:$0xff]  ;;  %v441_v39 = vld [vmem:[#allocation7 + $0x210] sm:$0xff] }
  0xb5   : > { %v1253_v40 = vpack.c.bf16 %v446_v33, %v442_v32  ;;  %v445_v41 = vld [vmem:[#allocation7 + $0x230] sm:$0xff]  ;;  %v448_v42 = vld [vmem:[#allocation7 + $0x248] sm:$0xff]  ;;  %v450_v44 = vld [vmem:[#allocation7 + $0x258] sm:$0xff]  ;;  %v1191_v46 = vpack.c.bf16 %v443_v38, %v439_v37 }
  0xb6   : > { %1180 = vmatpush1.bf16.msra.mxu0 %v1179_v10  ;;  %v452_v43 = vld [vmem:[#allocation7 + $0x268] sm:$0xff]  ;;  %v454_v45 = vld [vmem:[#allocation7 + $0x278] sm:$0xff]  ;;  %v1255_v47 = vpack.c.bf16 %v445_v41, %v441_v39  ;;  %v447_v49 = vld [vmem:[#allocation7 + $0x240] sm:$0xff] }
  0xb7   : > { %1244 = vmatpush1.bf16.msra.mxu1 %v1243_v11  ;;  %1182 = vmatprep.subr.bf16.mxu0 %v1181_v12  ;;  %v1193_v48 = vpack.c.bf16 %v452_v43, %v448_v42  ;;  %v451_v50 = vld [vmem:[#allocation7 + $0x260] sm:$0xff]  ;;  %v449_v51 = vld [vmem:[#allocation7 + $0x250] sm:$0xff]  ;;  %v1257_v52 = vpack.c.bf16 %v454_v45, %v450_v44  ;;  %v456_v54 = vld [vmem:[#allocation7 + $0x288] sm:$0xff] }
  0xb8   : > { %1246 = vmatprep.subr.bf16.mxu1 %v1245_v16  ;;  %v453_v53 = vld [vmem:[#allocation7 + $0x270] sm:$0xff]  ;;  %v460_v55 = vld [vmem:[#allocation7 + $0x2a8] sm:$0xff]  ;;  %v458_v56 = vld [vmem:[#allocation7 + $0x298] sm:$0xff]  ;;  %v1195_v58 = vpack.c.bf16 %v451_v50, %v447_v49 }
  0xb9   : > { %v462_v57 = vld [vmem:[#allocation7 + $0x2b8] sm:$0xff]  ;;  %v1259_v59 = vpack.c.bf16 %v453_v53, %v449_v51  ;;  %v1197_v60 = vpack.c.bf16 %v460_v55, %v456_v54  ;;  %v455_v61 = vld [vmem:[#allocation7 + $0x280] sm:$0xff]  ;;  %v457_v63 = vld [vmem:[#allocation7 + $0x290] sm:$0xff] }
  0xba   : > { %1184 = vmatpush1.bf16.msra.mxu0 %v1183_v22  ;;  %v459_v62 = vld [vmem:[#allocation7 + $0x2a0] sm:$0xff]  ;;  %v1261_v0 = vpack.c.bf16 %v462_v57, %v458_v56  ;;  %v461_v1 = vld [vmem:[#allocation7 + $0x2b0] sm:$0xff]  ;;  %v464_v2 = vld [vmem:[#allocation7 + $0x2c8] sm:$0xff] }
  0xbb   : > { %1248 = vmatpush1.bf16.msra.mxu1 %v1247_v23  ;;  %1186 = vmatprep.subr.bf16.mxu0 %v1185_v24  ;;  %v468_v3 = vld [vmem:[#allocation7 + $0x2e8] sm:$0xff]  ;;  %v466_v4 = vld [vmem:[#allocation7 + $0x2d8] sm:$0xff]  ;;  %v1199_v6 = vpack.c.bf16 %v459_v62, %v455_v61  ;;  %v463_v7 = vld [vmem:[#allocation7 + $0x2c0] sm:$0xff]  ;;  %v1263_v8 = vpack.c.bf16 %v461_v1, %v457_v63 }
  0xbc   : > { %1250 = vmatprep.subr.bf16.mxu1 %v1249_v28  ;;  %v470_v5 = vld [vmem:[#allocation7 + $0x2f8] sm:$0xff]  ;;  %v1201_v9 = vpack.c.bf16 %v468_v3, %v464_v2  ;;  %v467_v10 = vld [vmem:[#allocation7 + $0x2e0] sm:$0xff]  ;;  %v465_v11 = vld [vmem:[#allocation7 + $0x2d0] sm:$0xff] }
  0xbd   : > { %v469_v12 = vld [vmem:[#allocation7 + $0x2f0] sm:$0xff]  ;;  %v1265_v13 = vpack.c.bf16 %v470_v5, %v466_v4  ;;  %v472_v14 = vld [vmem:[#allocation7 + $0x308] sm:$0xff]  ;;  %v474_v17 = vld [vmem:[#allocation7 + $0x318] sm:$0xff]  ;;  %v1203_v20 = vpack.c.bf16 %v467_v10, %v463_v7 }
  0xbe   : > { %1188 = vmatpush1.bf16.msra.mxu0 %v1187_v34  ;;  %v476_v15 = vld [vmem:[#allocation7 + $0x328] sm:$0xff]  ;;  %v478_v18 = vld [vmem:[#allocation7 + $0x338] sm:$0xff]  ;;  %v1267_v21 = vpack.c.bf16 %v469_v12, %v465_v11  ;;  %v471_v23 = vld [vmem:[#allocation7 + $0x300] sm:$0xff] }
  0xbf   : > { %1252 = vmatpush1.bf16.msra.mxu1 %v1251_v35  ;;  %1190 = vmatprep.subr.bf16.mxu0 %v1189_v36  ;;  %v1936_v16 = vld [vmem:[%s313_s10] sm:$0xff]  ;;  %v372_v19 = vld [vmem:[%s322_s16] sm:$0xff]  ;;  %v1205_v22 = vpack.c.bf16 %v476_v15, %v472_v14  ;;  %v1269_v26 = vpack.c.bf16 %v478_v18, %v474_v17  ;;  %s1550_s10 = sshll.u32 %s1666_s22, 4  ;;  %s1551_s10 = int_to_ptr.vmem [resolvable:$false] %s1550_s10 }
  0xc0   : > { %1254 = vmatprep.subr.bf16.mxu1 %v1253_v40  ;;  %373 = vst [vmem:[%s1940_s17] sm:$0xff] %v1936_v16  ;;  %374 = vst [vmem:[%s1940_s17 + $0x8] sm:$0xff] %v372_v19  ;;  %591 = vmatprep.mubr.f32.mxu0 %v372_v19  ;;  %v475_v24 = vld [vmem:[#allocation7 + $0x320] sm:$0xff]  ;;  %v473_v25 = vld [vmem:[#allocation7 + $0x310] sm:$0xff]  ;;  %s1552_s9 = scalar_lea.vmem %s1551_s10, 512  ;;  %p1553_p4 = scmp.lt.s32.totalorder %s919_s19, %s1551_s10 }
  0xc1   : > { %v477_v27 = vld [vmem:[#allocation7 + $0x330] sm:$0xff]  ;;  %v480_v28 = vld [vmem:[#allocation7 + $0x348] sm:$0xff]  ;;  %662 = vmatprep.mubr.f32.mxu1 %v372_v19  ;;  %v482_v30 = vld [vmem:[#allocation7 + $0x358] sm:$0xff]  ;;  %v1207_v32 = vpack.c.bf16 %v475_v24, %v471_v23  ;;  %p1554_p7 = scmp.lt.s32.totalorder %s1552_s9, %s1546_s20 }
  0xc2   : > { %1192 = vmatpush1.bf16.msra.mxu0 %v1191_v46  ;;  %v484_v29 = vld [vmem:[#allocation7 + $0x368] sm:$0xff]  ;;  %v486_v31 = vld [vmem:[#allocation7 + $0x378] sm:$0xff]  ;;  %v1271_v33 = vpack.c.bf16 %v477_v27, %v473_v25  ;;  %v479_v35 = vld [vmem:[#allocation7 + $0x340] sm:$0xff] }
  0xc3   : > { %1256 = vmatpush1.bf16.msra.mxu1 %v1255_v47  ;;  %1194 = vmatprep.subr.bf16.mxu0 %v1193_v48  ;;  %v1209_v34 = vpack.c.bf16 %v484_v29, %v480_v28  ;;  %v483_v36 = vld [vmem:[#allocation7 + $0x360] sm:$0xff]  ;;  %v481_v37 = vld [vmem:[#allocation7 + $0x350] sm:$0xff]  ;;  %v1273_v38 = vpack.c.bf16 %v486_v31, %v482_v30  ;;  %v488_v40 = vld [vmem:[#allocation7 + $0x388] sm:$0xff]  ;;  %p1555_p3 = por %p1554_p7, %p1553_p4 }
  0xc4   : > { %1258 = vmatprep.subr.bf16.mxu1 %v1257_v52  ;;  %v485_v39 = vld [vmem:[#allocation7 + $0x370] sm:$0xff]  ;;  %v492_v41 = vld [vmem:[#allocation7 + $0x3a8] sm:$0xff]  ;;  %v490_v42 = vld [vmem:[#allocation7 + $0x398] sm:$0xff]  ;;  %v1211_v44 = vpack.c.bf16 %v483_v36, %v479_v35 }
  0xc5   : > { %v494_v43 = vld [vmem:[#allocation7 + $0x3b8] sm:$0xff]  ;;  %v1275_v45 = vpack.c.bf16 %v485_v39, %v481_v37  ;;  %v1213_v46 = vpack.c.bf16 %v492_v41, %v488_v40  ;;  %v487_v47 = vld [vmem:[#allocation7 + $0x380] sm:$0xff]  ;;  %v489_v49 = vld [vmem:[#allocation7 + $0x390] sm:$0xff]  ;;  %p1556_p5 = pnand %p1555_p3, %p1549_p10 }
  0xc6   : > { %1196 = vmatpush1.bf16.msra.mxu0 %v1195_v58  ;;  %v491_v48 = vld [vmem:[#allocation7 + $0x3a0] sm:$0xff]  ;;  %v1277_v50 = vpack.c.bf16 %v494_v43, %v490_v42  ;;  %v493_v51 = vld [vmem:[#allocation7 + $0x3b0] sm:$0xff]  ;;  %v496_v52 = vld [vmem:[#allocation7 + $0x3c8] sm:$0xff] }
  0xc7   : > { %1260 = vmatpush1.bf16.msra.mxu1 %v1259_v59  ;;  %1198 = vmatprep.subr.bf16.mxu0 %v1197_v60  ;;  %v500_v53 = vld [vmem:[#allocation7 + $0x3e8] sm:$0xff]  ;;  %v498_v54 = vld [vmem:[#allocation7 + $0x3d8] sm:$0xff]  ;;  %v1215_v56 = vpack.c.bf16 %v491_v48, %v487_v47  ;;  %v1279_v57 = vpack.c.bf16 %v493_v51, %v489_v49  ;;  %v495_v59 = vld [vmem:[#allocation7 + $0x3c0] sm:$0xff] }
  0xc8   : > { %1262 = vmatprep.subr.bf16.mxu1 %v1261_v0  ;;  %v502_v55 = vld [vmem:[#allocation7 + $0x3f8] sm:$0xff]  ;;  %v1217_v58 = vpack.c.bf16 %v500_v53, %v496_v52  ;;  %v499_v60 = vld [vmem:[#allocation7 + $0x3e0] sm:$0xff]  ;;  %v497_v61 = vld [vmem:[#allocation7 + $0x3d0] sm:$0xff] }
  0xc9   : > { %v1281_v62 = vpack.c.bf16 %v502_v55, %v498_v54  ;;  %v501_v63 = vld [vmem:[#allocation7 + $0x3f0] sm:$0xff]  ;;  %v689_v0 = vld [vmem:[#allocation8 + $0x80] sm:$0xff]  ;;  %v690_v1 = vld [vmem:[#allocation8 + $0x88] sm:$0xff]  ;;  %v1219_v4 = vpack.c.bf16 %v499_v60, %v495_v59 }
  0xca   : > { %1200 = vmatpush1.bf16.msra.mxu0 %v1199_v6  ;;  %v721_v2 = vld [vmem:[#allocation8 + $0x180] sm:$0xff]  ;;  %v722_v3 = vld [vmem:[#allocation8 + $0x188] sm:$0xff]  ;;  %v1283_v5 = vpack.c.bf16 %v501_v63, %v497_v61  ;;  %v1285_v6 = vpack.c.bf16 %v690_v1, %v689_v0  ;;  %v691_v12 = vld [vmem:[#allocation8 + $0x90] sm:$0xff] }
  0xcb   : > { %1264 = vmatpush1.bf16.msra.mxu1 %v1263_v8  ;;  %1202 = vmatprep.subr.bf16.mxu0 %v1201_v9  ;;  %v673_v7 = vld [vmem:[#allocation8] sm:$0xff]  ;;  %v674_v8 = vld [vmem:[#allocation8 + $0x8] sm:$0xff]  ;;  %v1317_v10 = vpack.c.bf16 %v722_v3, %v721_v2  ;;  %v723_v14 = vld [vmem:[#allocation8 + $0x190] sm:$0xff] }
  0xcc   : > { %1266 = vmatprep.subr.bf16.mxu1 %v1265_v13  ;;  %v705_v9 = vld [vmem:[#allocation8 + $0x100] sm:$0xff]  ;;  %v706_v11 = vld [vmem:[#allocation8 + $0x108] sm:$0xff]  ;;  %v692_v13 = vld [vmem:[#allocation8 + $0x98] sm:$0xff]  ;;  %v1287_v17 = vpack.c.bf16 %v674_v8, %v673_v7 }
  0xcd   : > { %v724_v15 = vld [vmem:[#allocation8 + $0x198] sm:$0xff]  ;;  %v1319_v18 = vpack.c.bf16 %v706_v11, %v705_v9  ;;  %v1289_v19 = vpack.c.bf16 %v692_v13, %v691_v12  ;;  %v693_v25 = vld [vmem:[#allocation8 + $0xa0] sm:$0xff]  ;;  %v726_v28 = vld [vmem:[#allocation8 + $0x1a8] sm:$0xff] }
  0xce   : > { %1204 = vmatpush1.bf16.msra.mxu0 %v1203_v20  ;;  %v675_v20 = vld [vmem:[#allocation8 + $0x10] sm:$0xff]  ;;  %v1321_v23 = vpack.c.bf16 %v724_v15, %v723_v14  ;;  %v708_v24 = vld [vmem:[#allocation8 + $0x118] sm:$0xff]  ;;  %v725_v27 = vld [vmem:[#allocation8 + $0x1a0] sm:$0xff] }
  0xcf   : > { %1268 = vmatpush1.bf16.msra.mxu1 %v1267_v21  ;;  %1206 = vmatprep.subr.bf16.mxu0 %v1205_v22  ;;  %v676_v21 = vld [vmem:[#allocation8 + $0x18] sm:$0xff]  ;;  %v707_v22 = vld [vmem:[#allocation8 + $0x110] sm:$0xff]  ;;  %v1325_v35 = vpack.c.bf16 %v726_v28, %v725_v27  ;;  %v710_v36 = vld [vmem:[#allocation8 + $0x128] sm:$0xff] }
  0xd0   : > { %1270 = vmatprep.subr.bf16.mxu1 %v1269_v26  ;;  %v694_v26 = vld [vmem:[#allocation8 + $0xa8] sm:$0xff]  ;;  %v1291_v29 = vpack.c.bf16 %v676_v21, %v675_v20  ;;  %v1323_v30 = vpack.c.bf16 %v708_v24, %v707_v22  ;;  %v695_v37 = vld [vmem:[#allocation8 + $0xb0] sm:$0xff]  ;;  %v728_v40 = vld [vmem:[#allocation8 + $0x1b8] sm:$0xff] }
  0xd1   : > { %v1293_v31 = vpack.c.bf16 %v694_v26, %v693_v25  ;;  %v727_v39 = vld [vmem:[#allocation8 + $0x1b0] sm:$0xff]  ;;  %v712_v47 = vld [vmem:[#allocation8 + $0x138] sm:$0xff]  ;;  %v697_v48 = vld [vmem:[#allocation8 + $0xc0] sm:$0xff] }
  0xd2   : > { %1208 = vmatpush1.bf16.msra.mxu0 %v1207_v32  ;;  %v677_v32 = vld [vmem:[#allocation8 + $0x20] sm:$0xff]  ;;  %v679_v43 = vld [vmem:[#allocation8 + $0x30] sm:$0xff]  ;;  %v698_v49 = vld [vmem:[#allocation8 + $0xc8] sm:$0xff] }
  0xd3   : > { %1272 = vmatpush1.bf16.msra.mxu1 %v1271_v33  ;;  %1210 = vmatprep.subr.bf16.mxu0 %v1209_v34  ;;  %v678_v33 = vld [vmem:[#allocation8 + $0x28] sm:$0xff]  ;;  %v709_v34 = vld [vmem:[#allocation8 + $0x120] sm:$0xff]  ;;  %v1301_v54 = vpack.c.bf16 %v698_v49, %v697_v48  ;;  %v699_v60 = vld [vmem:[#allocation8 + $0xd0] sm:$0xff] }
  0xd4   : > { %1274 = vmatprep.subr.bf16.mxu1 %v1273_v38  ;;  %v696_v38 = vld [vmem:[#allocation8 + $0xb8] sm:$0xff]  ;;  %v1295_v41 = vpack.c.bf16 %v678_v33, %v677_v32  ;;  %v730_v51 = vld [vmem:[#allocation8 + $0x1c8] sm:$0xff]  ;;  %v681_v55 = vld [vmem:[#allocation8 + $0x40] sm:$0xff] }
  0xd5   : > { %v1297_v42 = vpack.c.bf16 %v696_v38, %v695_v37  ;;  %v714_v59 = vld [vmem:[#allocation8 + $0x148] sm:$0xff]  ;;  %v700_v61 = vld [vmem:[#allocation8 + $0xd8] sm:$0xff]  ;;  %v683_v3 = vld [vmem:[#allocation8 + $0x50] sm:$0xff] }
  0xd6   : > { %1212 = vmatpush1.bf16.msra.mxu0 %v1211_v44  ;;  %v680_v44 = vld [vmem:[#allocation8 + $0x38] sm:$0xff]  ;;  %v1305_v2 = vpack.c.bf16 %v700_v61, %v699_v60  ;;  %v701_v8 = vld [vmem:[#allocation8 + $0xe0] sm:$0xff]  ;;  %v702_v9 = vld [vmem:[#allocation8 + $0xe8] sm:$0xff] }
  0xd7   : > { %1276 = vmatpush1.bf16.msra.mxu1 %v1275_v45  ;;  %1214 = vmatprep.subr.bf16.mxu0 %v1213_v46  ;;  %v711_v45 = vld [vmem:[#allocation8 + $0x130] sm:$0xff]  ;;  %v1329_v46 = vpack.c.bf16 %v728_v40, %v727_v39  ;;  %v1299_v52 = vpack.c.bf16 %v680_v44, %v679_v43  ;;  %v732_v63 = vld [vmem:[#allocation8 + $0x1d8] sm:$0xff]  ;;  %v734_v11 = vld [vmem:[#allocation8 + $0x1e8] sm:$0xff]  ;;  %v1309_v14 = vpack.c.bf16 %v702_v9, %v701_v8 }
  0xd8   : > { %1278 = vmatprep.subr.bf16.mxu1 %v1277_v50  ;;  %v729_v50 = vld [vmem:[#allocation8 + $0x1c0] sm:$0xff]  ;;  %v1331_v53 = vpack.c.bf16 %v712_v47, %v711_v45  ;;  %v716_v7 = vld [vmem:[#allocation8 + $0x158] sm:$0xff]  ;;  %v718_v21 = vld [vmem:[#allocation8 + $0x168] sm:$0xff] }
  0xd9   : > { %v704_v24 = vld [vmem:[#allocation8 + $0xf8] sm:$0xff]  ;;  %v735_v25 = vld [vmem:[#allocation8 + $0x1f0] sm:$0xff]  ;;  %v505_v38 = vld [vmem:[%s2030_s3] sm:$0xf] }
  0xda   : > { %1216 = vmatpush1.bf16.msra.mxu0 %v1215_v56  ;;  %v682_v56 = vld [vmem:[#allocation8 + $0x48] sm:$0xff]  ;;  %v736_v27 = vld [vmem:[#allocation8 + $0x1f8] sm:$0xff]  ;;  %v687_v28 = vld [vmem:[#allocation8 + $0x70] sm:$0xff] }
  0xdb   : > { %1280 = vmatpush1.bf16.msra.mxu1 %v1279_v57  ;;  %1218 = vmatprep.subr.bf16.mxu0 %v1217_v58  ;;  %v713_v57 = vld [vmem:[#allocation8 + $0x140] sm:$0xff]  ;;  %v1333_v58 = vpack.c.bf16 %v730_v51, %v729_v50  ;;  %v1303_v0 = vpack.c.bf16 %v682_v56, %v681_v55  ;;  %v719_v32 = vld [vmem:[#allocation8 + $0x170] sm:$0xff]  ;;  %v720_v33 = vld [vmem:[#allocation8 + $0x178] sm:$0xff] }
  0xdc   : > { %1282 = vmatprep.subr.bf16.mxu1 %v1281_v62  ;;  %v731_v62 = vld [vmem:[#allocation8 + $0x1d0] sm:$0xff]  ;;  %v1335_v1 = vpack.c.bf16 %v714_v59, %v713_v57 }
  0xde   : > { %1220 = vmatpush1.bf16.msra.mxu0 %v1219_v4  ;;  %v684_v4 = vld [vmem:[#allocation8 + $0x58] sm:$0xff] }
  0xdf   : > { %1284 = vmatpush1.bf16.msra.mxu1 %v1283_v5  ;;  %1286 = vmatprep.subr.bf16.mxu0 %v1285_v6  ;;  %v715_v5 = vld [vmem:[#allocation8 + $0x150] sm:$0xff]  ;;  %v1337_v6 = vpack.c.bf16 %v732_v63, %v731_v62  ;;  %v1307_v12 = vpack.c.bf16 %v684_v4, %v683_v3 }
  0xe0   : > { %1318 = vmatprep.subr.bf16.mxu1 %v1317_v10  ;;  %v733_v10 = vld [vmem:[#allocation8 + $0x1e0] sm:$0xff]  ;;  %v1339_v13 = vpack.c.bf16 %v716_v7, %v715_v5 }
  0xe1   : > { %592 = vmatmul.mubr.f32.vlgmr.msra.gmra.mrb[0].mxu0 %v1936_v16  ;;  %v1341_v15 = vpack.c.bf16 %v734_v11, %v733_v10 }
  0xe2   : > { %663 = vmatmul.mubr.f32.vlgmr.msra.gmra.mrb[0].mxu1 %v1936_v16  ;;  %1288 = vmatpush3.bf16.msra.mxu0 %v1287_v17  ;;  %v1327_v16 = vpack.c.bf16 %v710_v36, %v709_v34  ;;  %v685_v17 = vld [vmem:[#allocation8 + $0x60] sm:$0xff]  ;;  %v1347_v34 = vpack.c.bf16 %v720_v33, %v719_v32 }
  0xe3   : > { %1320 = vmatpush3.bf16.msra.mxu1 %v1319_v18  ;;  %1290 = vmatprep.subr.bf16.mxu0 %v1289_v19  ;;  %v686_v18 = vld [vmem:[#allocation8 + $0x68] sm:$0xff]  ;;  %v717_v19 = vld [vmem:[#allocation8 + $0x160] sm:$0xff] }
  0xe4   : > { %1322 = vmatprep.subr.bf16.mxu1 %v1321_v23  ;;  %v1311_v20 = vpack.c.bf16 %v686_v18, %v685_v17  ;;  %v1343_v22 = vpack.c.bf16 %v718_v21, %v717_v19  ;;  %v703_v23 = vld [vmem:[#allocation8 + $0xf0] sm:$0xff] }
  0xe5   : > { %v1313_v26 = vpack.c.bf16 %v704_v24, %v703_v23 }
  0xe6   : > { %1292 = vmatpush3.bf16.msra.mxu0 %v1291_v29  ;;  %v688_v29 = vld [vmem:[#allocation8 + $0x78] sm:$0xff] }
  0xe7   : > { %1324 = vmatpush3.bf16.msra.mxu1 %v1323_v30  ;;  %1294 = vmatprep.subr.bf16.mxu0 %v1293_v31  ;;  %v1345_v30 = vpack.c.bf16 %v736_v27, %v735_v25  ;;  %v1315_v31 = vpack.c.bf16 %v688_v29, %v687_v28 }
  0xe8   : > { %1326 = vmatprep.subr.bf16.mxu1 %v1325_v35  ;;  %v507_v35 = vlaneseq }
  0xea   : > { %1296 = vmatpush3.bf16.msra.mxu0 %v1295_v41  ;;  %v508_v36 = vshrl.u32 %v507_v35, 7 }
  0xeb   : > { %1328 = vmatpush3.bf16.msra.mxu1 %v1327_v16  ;;  %1298 = vmatprep.subr.bf16.mxu0 %v1297_v42 }
  0xec   : > { %1330 = vmatprep.subr.bf16.mxu1 %v1329_v46  ;;  %v509_v37 = vsub.s32 0, %v508_v36  ;;  %v517_v39 = vsub.s32 2, %v508_v36  ;;  %v513_v40 = vsub.s32 1, %v508_v36  ;;  %v521_v41 = vsub.s32 3, %v508_v36 }
  0xee   : > { %1300 = vmatpush3.bf16.msra.mxu0 %v1299_v52  ;;  %v510_v16 = vrot.slane %v505_v38, %v509_v37  ;;  %v518_v42 = vrot.slane %v505_v38, %v517_v39  ;;  %v514_v43 = vrot.slane %v505_v38, %v513_v40  ;;  %v522_v44 = vrot.slane %v505_v38, %v521_v41 }
  0xef   : > { %1332 = vmatpush3.bf16.msra.mxu1 %v1331_v53  ;;  %1302 = vmatprep.subr.bf16.mxu0 %v1301_v54 }
  0xf0   : > { %1334 = vmatprep.subr.bf16.mxu1 %v1333_v58 }
  0xf2   : > { %1304 = vmatpush3.bf16.msra.mxu0 %v1303_v0 }
  0xf3   : > { %1336 = vmatpush3.bf16.msra.mxu1 %v1335_v1  ;;  %1306 = vmatprep.subr.bf16.mxu0 %v1305_v2 }
  0xf4   : > { %1338 = vmatprep.subr.bf16.mxu1 %v1337_v6 }
  0xf6   : > { %1308 = vmatpush3.bf16.msra.mxu0 %v1307_v12 }
  0xf7   : > { %1340 = vmatpush3.bf16.msra.mxu1 %v1339_v13  ;;  %1310 = vmatprep.subr.bf16.mxu0 %v1309_v14 }
  0xf8   : > { %1342 = vmatprep.subr.bf16.mxu1 %v1341_v15 }
  0xfa   : > { %1312 = vmatpush3.bf16.msra.mxu0 %v1311_v20 }
  0xfb   : > { %1344 = vmatpush3.bf16.msra.mxu1 %v1343_v22  ;;  %1314 = vmatprep.subr.bf16.mxu0 %v1313_v26 }
  0xfc   : > { %1346 = vmatprep.subr.bf16.mxu1 %v1345_v30 }
  0xfe   : > { %1316 = vmatpush3.bf16.msra.mxu0 %v1315_v31 }
  0xff   : > { %1348 = vmatpush3.bf16.msra.mxu1 %v1347_v34 }
 0x1b4   : > { %v593_v45 = vpop.f32.mrb[0].mxu0 }
 0x1b5   : > { %v594_v46 = vadd.f32 %v593_v45, %v510_v16  ;;  %v664_v47 = vpop.f32.mrb[0].mxu1  ;;  %v595_v48 = vpop.f32.mrb[1].mxu0 }
 0x1b6   : > { %v665_v49 = vadd.f32 %v664_v47, %v518_v42  ;;  %v596_v50 = vadd.f32 %v595_v48, %v514_v43  ;;  %v666_v51 = vpop.f32.mrb[1].mxu1 }
 0x1b7   : > { %v667_v52 = vadd.f32 %v666_v51, %v522_v44  ;;  %v669_v55 = vmax.f32 %v594_v46, 0.0 }
 0x1b8   : > { %v671_v53 = vmax.f32 %v665_v49, 0.0  ;;  %v670_v54 = vmax.f32 %v596_v50, 0.0 }
 0x1b9   : > { %v672_v56 = vmax.f32 %v667_v52, 0.0 }
 0x1ba   : > { %808 = vmatprep.mubr.f32.mxu0 %v670_v54 }
 0x1bb   : > { %878 = vmatprep.mubr.f32.mxu1 %v672_v56  ;;  %809 = vmatmul.mubr.f32.vlgmr.msra.gmra.mrb[2].mxu0 %v669_v55 }
 0x1bc   : > { %879 = vmatmul.mubr.f32.vlgmr.msra.gmra.mrb[2].mxu1 %v671_v53 }
 0x1bd   : > { %1559 = shalt.err (!%p1556_p5)
}
 0x1be   : > { %s1560_s29 = scalar_lea.hbm %s1955_s11, 256  ;;  %s1564_s17 = scalar_lea.hbm %s2034_s7, 512 }
 0x1bf   : > { %p1561_p1 = scmp.ne.s32.totalorder %s1955_s11, %s1560_s29  ;;  %p1565_p0 = scmp.lt.u32.totalorder %s1955_s11, %s2034_s7 }
 0x1c0   : > { %p1566_p9 = scmp.lt.u32.totalorder %s1564_s17, %s1560_s29  ;;  %p1568_p2 = scmp.lt.u32.totalorder %s1560_s29, %s1955_s11 }
 0x1c1   : > { %p1562_p8 = pnand %p1561_p1, %p2059_p13 }
 0x1c2   : > { %p1567_p12 = por %p1566_p9, %p1565_p0 }
 0x1c3   : > { %p1563_p11 = pneg %p1562_p8 }
 0x1c4   : > { %p1569_p6 = por %p1568_p2, %p1567_p12 }
 0x1c6   : > { %p1570_p10 = pnand %p1569_p6, %p1563_p11 }
 0x1c8   : > { %1573 = shalt.err (!%p1570_p10)
}
 0x1c9   : > { %1362 = dma.vmem_to_hbm [thread:$0]  (%p2059_p13), %s919_s19, 256, %s1955_s11, %s891_s23   ;;  %v1078_v59 = vld [vmem:[%s2032_s5] ss:$0 sm:$0xff] }
 0x1ca   : > { %s1081_s14 = sshll.u32 %s1729_s28, 7  ;;  %s363_s20 = scalar_lea.vmem [#allocation10], %s1911_s2 }
 0x1cb   : > { %s904_s22 = sshll.u32 %s363_s20, 4  ;;  %s1983_s19 = scalar_lea.hbm %s2033_s6, %s1081_s14  ;;  %s1985_s22 = int_to_ptr.vmem [resolvable:$true] %s904_s22 }
 0x1cc   : > { %s886_s11 = scalar_lea.sflag [#allocation4], %s1908_s21  ;;  %s1574_s23 = scalar_lea.vmem %s1985_s22, 128 }
 0x1cd   : > { %p1575_p4 = scmp.ne.s32.totalorder %s1985_s22, %s1574_s23  ;;  %s1667_s28 = smov [#allocation10]  }
 0x1ce   : > { %s1578_s2 = sshll.u32 %s1667_s28, 4  ;;  %s1579_s2 = int_to_ptr.vmem [resolvable:$false] %s1578_s2 }
 0x1cf   : > { %p1576_p7 = pnand %p1575_p4, %p2059_p13  ;;  %s1580_s29 = scalar_lea.vmem %s1579_s2, 256 }
 0x1d0   : > { %p1581_p5 = scmp.lt.s32.totalorder %s1985_s22, %s1579_s2  ;;  %p1582_p1 = scmp.lt.s32.totalorder %s1580_s29, %s1574_s23 }
 0x1d1   : > { %p1577_p3 = pneg %p1576_p7 }
 0x1d2   : > { %p1583_p8 = por %p1582_p1, %p1581_p5 }
 0x1d4   : > { %p1584_p11 = pnand %p1583_p8, %p1577_p3 }
 0x28e   : > { %v1119_v57 = vpop.f32.mrb[2].mxu0 }
 0x28f   : > { %v1154_v58 = vpop.f32.mrb[2].mxu1  ;;  %v1120_v60 = vpop.f32.mrb[3].mxu0 }
 0x290   : > { %v1121_v61 = vadd.f32 %v1120_v60, %v1119_v57  ;;  %v1155_v62 = vpop.f32.mrb[3].mxu1 }
 0x291   : > { %v1156_v63 = vadd.f32 %v1155_v62, %v1154_v58 }
 0x292   : > { %v811_v0 = vadd.f32 %v1121_v61, %v1078_v59 }
 0x294   : > { %v881_v1 = vadd.f32 %v1156_v63, %v811_v0 }
 0x296   : > { %884 = vst [vmem:[%s363_s20] sm:$0xff] %v881_v1 }
 0x297   : > { %1587 = shalt.err (!%p1584_p11)
}
 0x298   : > { %s1588_s21 = scalar_lea.hbm %s1983_s19, 128  ;;  %s1592_s17 = scalar_lea.hbm %s2033_s6, 256 }
 0x299   : > { %p1589_p0 = scmp.ne.s32.totalorder %s1983_s19, %s1588_s21  ;;  %p1593_p2 = scmp.lt.u32.totalorder %s1983_s19, %s2033_s6 }
 0x29a   : > { %p1594_p6 = scmp.lt.u32.totalorder %s1592_s17, %s1588_s21  ;;  %p1596_p4 = scmp.lt.u32.totalorder %s1588_s21, %s1983_s19 }
 0x29b   : > { %p1590_p9 = pnand %p1589_p0, %p2059_p13 }
 0x29c   : > { %p1595_p10 = por %p1594_p6, %p1593_p2 }
 0x29d   : > { %p1591_p12 = pneg %p1590_p9 }
 0x29e   : > { %p1597_p7 = por %p1596_p4, %p1595_p10 }
 0x2a0   : > { %p1598_p3 = pnand %p1597_p7, %p1591_p12 }
 0x2a2   : > { %1601 = shalt.err (!%p1598_p3)
}
 0x2a3   : > { %1361 = dma.vmem_to_hbm [thread:$0]  (%p2059_p13), %s1985_s22, 128, %s1983_s19, %s886_s11  }
 0x2a4 PF: > { %s930_s4 = sand.u32 1, %s1644_s24   ;;  %p2060_p5 = scmp.ne.s32.totalorder %s2044_s8, 0 }
 0x2a5   : > { %p2061_p1 = scmp.ge.s32.totalorder %s1656_s27, 2  ;;  %s931_s26 = scalar_lea.sflag [#allocation4], %s930_s4 }
 0x2a7   : > { %p1380_p8 = pnand %p2061_p1, %p2060_p5 }
 0x2a9   : > { %1635 = dma.done.wait (!%p1380_p8), %s931_s26, 128  }
 0x2aa   : > { %1637 = vsyncadd (!%p1380_p8), %s931_s26, 4294967168  ;;  %s940_s14 = scalar_lea.sflag [#allocation12], %s930_s4 }
 0x2ab   : > { %1639 = dma.done.wait (!%p1380_p8), %s940_s14, 256  }
 0x2ac   : > { %1641 = vsyncadd (!%p1380_p8), %s940_s14, 4294967040  ;;  %s2062_s18 = sld [smem:[#allocation19_spill]]  ;;  %s2063_s26 = sld [smem:[#allocation20_spill]] }
 0x2ad   : > { %p28_p13 = scmp.ge.s32.totalorder %s1818_s13, 4   ;;  %s2064_s24 = smov %s1648_s25 }
 0x2ae   : > { %s2066_s27 = smov %s1818_s13 }
 0x2af   :  { %30 = sbr.rel (!%p28_p13) target bundleno = 13 (0xd), region = 127 }
 0x2b2   : > { %s2065_s25 = smov %s2062_s18 }
 0x2b6   :  { %945 = vsyncpa [#allocation3], 1 }
 0x2b7   :  { %947 = vsyncpa [#allocation3 + $0x1], 1 }
 0x2b8   :  { %948 = vsyncpa [#allocation6], 1 }
 0x2b9   :  { %950 = vsyncpa [#allocation6 + $0x1], 1 }
 0x2ba   :  { %951 = vsyncpa [#allocation9], 1 }
 0x2bb   :  { %952 = vsyncpa [#allocation4], 1 }
 0x2bc   :  { %954 = vsyncpa [#allocation4 + $0x1], 1 }
 0x2bd   :  { %955 = vsyncpa [#allocation12], 1 }
 0x2be   :  { %957 = vsyncpa [#allocation12 + $0x1], 1 }

</bundles_post_ra>
